<compile_context>
chip_gen: v7x
topology: tpu7x:2x2x1
jax: 0.10.0
libtpu: 0.0.40
codegen_flags: <defaults>
</compile_context>

<pallas_src>
import functools

import jax
import jax.numpy as jnp
import numpy as np
from jax.experimental import pallas as pl
from jax.experimental.pallas import tpu as pltpu


def _round_up(x, m):
    return ((x + m - 1) // m) * m


def _vmem_capacity_bytes():
    """Per-core VMEM capacity (conservative 64 MiB fallback = v7x)."""
    try:
        cap = getattr(pltpu.get_tpu_info(), "vmem_capacity_bytes", None)
        if cap:
            return int(cap)
    except Exception:
        pass
    return 64 * 1024 * 1024


def _mlp_kernel(x_ref, w1_ref, b1_ref, w2_ref, b2_ref, o_ref, acc_ref, *,
                compute_dtype):
    k = pl.program_id(1)

    @pl.when(k == 0)
    def _init():
        acc_ref[...] = jnp.zeros_like(acc_ref)

    # Layer 1 (this hidden chunk). x is cast to the MXU compute dtype in-kernel
    # so the wrapper never materializes a cast copy in HBM.
    xc = x_ref[...].astype(compute_dtype)
    h = jnp.dot(xc, w1_ref[...], preferred_element_type=jnp.float32)
    # Bias + ReLU in f32 on the accumulator (v5e has no bf16 VPU path).
    h = jnp.maximum(h + b1_ref[...], 0.0)
    # Layer 2 partial product for this hidden chunk, accumulated in f32.
    acc_ref[...] += jnp.dot(h.astype(w2_ref.dtype), w2_ref[...],
                            preferred_element_type=jnp.float32)

    @pl.when(k == pl.num_programs(1) - 1)
    def _finalize():
        o_ref[...] = (acc_ref[...] + b2_ref[...]).astype(o_ref.dtype)


def init_params(key, input_dim, hidden_dim, output_dim, dtype=jnp.float32):
    """PyTorch nn.Linear default init (U[-1/sqrt(fan_in), 1/sqrt(fan_in)])."""
    k1, k2, k3, k4 = jax.random.split(key, 4)
    bound1 = 1.0 / np.sqrt(input_dim)
    bound2 = 1.0 / np.sqrt(hidden_dim)
    # Stored transposed vs torch: (in, out)
    w1 = jax.random.uniform(k1, (input_dim, hidden_dim), dtype, -bound1, bound1)
    b1 = jax.random.uniform(k2, (1, hidden_dim), dtype, -bound1, bound1)
    w2 = jax.random.uniform(k3, (hidden_dim, output_dim), dtype, -bound2, bound2)
    b2 = jax.random.uniform(k4, (1, output_dim), dtype, -bound2, bound2)
    return w1, b1, w2, b2


def prepare_params(w1, b1, w2, b2, compute_dtype=jnp.bfloat16):
    """Pad weights to lane-dense (multiple-of-128) shapes and cast to the MXU
    compute dtype ONCE (hoisted out of the per-forward path)."""
    d_in, hidden = w1.shape
    d_out = w2.shape[-1]
    d_in_p, hidden_p, d_out_p = (_round_up(d, 128) for d in (d_in, hidden, d_out))
    w1p = jnp.zeros((d_in_p, hidden_p), compute_dtype).at[:d_in, :hidden].set(
        w1.astype(compute_dtype))
    b1p = jnp.zeros((1, hidden_p), jnp.float32).at[:, :hidden].set(
        jnp.reshape(b1, (1, -1)).astype(jnp.float32))
    w2p = jnp.zeros((hidden_p, d_out_p), compute_dtype).at[:hidden, :d_out].set(
        w2.astype(compute_dtype))
    b2p = jnp.zeros((1, d_out_p), jnp.float32).at[:, :d_out].set(
        jnp.reshape(b2, (1, -1)).astype(jnp.float32))
    return {"w1": w1p, "b1": b1p, "w2": w2p, "b2": b2p,
            "d_in": d_in, "hidden": hidden, "d_out": d_out,
            "compute_dtype": compute_dtype}


def mlp_forward(x, params):
    """x: (batch, ...) -> (batch, -1, output_dim), matching the PyTorch module."""
    w1p, b1p, w2p, b2p = params["w1"], params["b1"], params["w2"], params["b2"]
    d_in, hidden, d_out = params["d_in"], params["hidden"], params["d_out"]
    compute_dtype = params["compute_dtype"]

    batch = x.shape[0]
    x2d = x.reshape(batch, -1)                      # flatten(start_dim=1)
    assert x2d.shape[1] == d_in, (x2d.shape, d_in)
    out_dtype = x2d.dtype

    d_in_p, hidden_p = w1p.shape
    d_out_p = w2p.shape[1]

    c_size = jnp.dtype(compute_dtype).itemsize
    x_size = jnp.dtype(x2d.dtype).itemsize
    o_size = jnp.dtype(out_dtype).itemsize

    vmem_cap = _vmem_capacity_bytes()
    vmem_budget = int(0.65 * vmem_cap)

    # Batch tile: packed-sublane aligned for the compute dtype (16 for bf16),
    # larger cap on 128-MiB parts, and >=2 tiles when batch allows (pipelining
    # + v7x megacore sharding).
    sub = max(8, 32 // c_size)
    max_tile = 512 if vmem_cap >= 96 * 1024 * 1024 else 256
    if batch >= 2 * sub:
        tile_b = min(max_tile, _round_up((batch + 1) // 2, sub))
    else:
        tile_b = _round_up(max(batch, 1), sub)

    def fixed_bytes(tb):
        return (2 * tb * d_in_p * x_size          # x tile (double-buffered)
                + 2 * tb * d_out_p * o_size       # out tile (double-buffered)
                + tb * d_out_p * 4                # f32 accumulator scratch
                + 2 * d_out_p * 4)                # b2

    def chunk_bytes(tb, tk, nbuf):
        return (nbuf * (d_in_p + d_out_p) * tk * c_size   # W1 / W2 chunks
                + nbuf * tk * 4                           # b1 chunk
                + tb * tk * 4 + tb * tk * c_size)         # h f32 + bf16 cast copy

    # Shrink the batch tile if even the smallest hidden chunk would not fit.
    while tile_b > sub and fixed_bytes(tile_b) + chunk_bytes(tile_b, 128, 2) > vmem_budget:
        tile_b = _round_up(tile_b // 2, sub)
    # TODO(synk): if d_in_p alone blows the budget (x tile + W1 column chunk),
    # add a K-reduction grid axis over D_in for layer 1 as well.

    batch_p = _round_up(batch, tile_b)
    n_b = batch_p // tile_b

    # Hidden chunk: largest lane-aligned divisor of hidden_p that fits VMEM.
    tk_h = 128
    for n in range(1, hidden_p // 128 + 1):
        if hidden_p % n:
            continue
        cand = hidden_p // n
        if cand % 128:
            continue
        nbuf = 1 if n == 1 else 2
        if fixed_bytes(tile_b) + chunk_bytes(tile_b, cand, nbuf) <= vmem_budget:
            tk_h = cand
            break
    n_h = hidden_p // tk_h
    resident = (n_h == 1)        # weights grid-invariant -> single-buffer them

    # Pad x only if needed; keep its original dtype (cast happens in-kernel).
    if batch_p == batch and d_in_p == d_in:
        xp = x2d
    else:
        xp = jnp.zeros((batch_p, d_in_p), x2d.dtype).at[:batch, :d_in].set(x2d)

    flops = 2 * batch_p * hidden_p * (d_in_p + d_out_p)
    weight_reads = (1 if resident else n_b) * (d_in_p + d_out_p) * hidden_p * c_size
    bytes_accessed = (batch_p * d_in_p * x_size + weight_reads
                      + (hidden_p + d_out_p) * 4
                      + batch_p * d_out_p * o_size)

    nbuf_w = 1 if resident else 2
    vmem_bytes = fixed_bytes(tile_b) + chunk_bytes(tile_b, tk_h, nbuf_w)
    vmem_limit = max(32 * 1024 * 1024, int(1.5 * vmem_bytes))
    vmem_limit = int(min(vmem_limit, vmem_cap - 2 * 1024 * 1024))

    kernel = functools.partial(_mlp_kernel, compute_dtype=compute_dtype)

    def spec(shape, index_map, nbuf=None):
        if nbuf is None:
            return pl.BlockSpec(shape, index_map)
        return pl.BlockSpec(shape, index_map, pipeline_mode=pl.Buffered(nbuf))

    def run(single_buffer_resident):
        w_nbuf = 1 if (single_buffer_resident and resident) else None
        b2_nbuf = 1 if single_buffer_resident else None
        return pl.pallas_call(
            kernel,
            out_shape=jax.ShapeDtypeStruct((batch_p, d_out_p), out_dtype),
            grid_spec=pltpu.PrefetchScalarGridSpec(
                num_scalar_prefetch=0,
                grid=(n_b, n_h),
                in_specs=[
                    spec((tile_b, d_in_p), lambda i, k: (i, 0)),         # x tile
                    spec((d_in_p, tk_h), lambda i, k: (0, k), w_nbuf),   # W1 chunk
                    spec((1, tk_h), lambda i, k: (0, k), w_nbuf),        # b1 chunk
                    spec((tk_h, d_out_p), lambda i, k: (k, 0), w_nbuf),  # W2 chunk
                    spec((1, d_out_p), lambda i, k: (0, 0), b2_nbuf),    # b2
                ],
                out_specs=pl.BlockSpec((tile_b, d_out_p), lambda i, k: (i, 0)),
                scratch_shapes=[pltpu.VMEM((tile_b, d_out_p), jnp.float32)],
            ),
            compiler_params=pltpu.CompilerParams(
                dimension_semantics=("parallel", "arbitrary"),
                vmem_limit_bytes=vmem_limit),
            cost_estimate=pl.CostEstimate(
                flops=flops, transcendentals=0, bytes_accessed=bytes_accessed),
        )(xp, w1p, b1p, w2p, b2p)

    try:
        out_padded = run(True)
    except Exception:
        # Fallback if pipeline_mode=pl.Buffered(1) is unsupported on this build.
        out_padded = run(False)

    out2d = out_padded[:batch, :d_out]
    return out2d.reshape(batch, -1, d_out)           # x.view(batch, -1, D_out)


def mlp_forward_ref(x, w1, b1, w2, b2, output_dim, compute_dtype=jnp.bfloat16):
    """Pure-JAX reference using the same bf16-matmul / f32-accumulate recipe."""
    batch = x.shape[0]
    x2d = x.reshape(batch, -1).astype(compute_dtype)
    h = jnp.dot(x2d, w1.astype(compute_dtype), preferred_element_type=jnp.float32)
    h = jnp.maximum(h + b1.reshape(1, -1).astype(jnp.float32), 0.0)
    out = jnp.dot(h.astype(compute_dtype), w2.astype(compute_dtype),
                  preferred_element_type=jnp.float32)
    out = out + b2.reshape(1, -1).astype(jnp.float32)
    return out.astype(x.dtype).reshape(batch, -1, output_dim)


if __name__ == "__main__":
    # batch=2, channels=4, spatial=16x16 -> flatten to D_in=1024
    batch, channels, spatial = 2, 4, 16
    input_dim = channels * spatial * spatial
    hidden_dim, output_dim = 64, 16

    key = jax.random.PRNGKey(0)
    kx, kp = jax.random.split(key)
    x = jax.random.normal(kx, (batch, channels, spatial, spatial), dtype=jnp.float32)
    w1, b1, w2, b2 = init_params(kp, input_dim, hidden_dim, output_dim)

    params = prepare_params(w1, b1, w2, b2)          # pad/cast once, not per call
    out = mlp_forward(x, params)
    out = jax.block_until_ready(out)

    ref = mlp_forward_ref(x, w1, b1, w2, b2, output_dim)
    assert out.shape == (batch, 1, output_dim), out.shape
    np.testing.assert_allclose(np.asarray(out), np.asarray(ref),
                               rtol=1e-2, atol=1e-2)

    print("KERNEL_OK")
</pallas_src>

<mosaic_0001>
module attributes {stable_mosaic.version = 11 : i64} {
  func.func @_mlp_kernel(%arg0: i32, %arg1: i32, %arg2: memref<16x1024xf32, #tpu.memory_space<vmem>>, %arg3: memref<1024x128xbf16, #tpu.memory_space<vmem>>, %arg4: memref<1x128xf32, #tpu.memory_space<vmem>>, %arg5: memref<128x128xbf16, #tpu.memory_space<vmem>>, %arg6: memref<1x128xf32, #tpu.memory_space<vmem>>, %arg7: memref<16x128xf32, #tpu.memory_space<vmem>>, %arg8: memref<16x128xf32, #tpu.memory_space<vmem>>) attributes {dimension_semantics = [#tpu.dimension_semantics<parallel>, #tpu.dimension_semantics<arbitrary>], iteration_bounds = array<i64: 1, 1>, scalar_prefetch = 0 : i64, scratch_operands = 1 : i64, tpu.core_type = #tpu.core_type<tc>, window_params = [{transform_indices = @transform_0, window_bounds = array<i64: 16, 1024>}, {pipeline_mode = #tpu.pipeline_mode<synchronous>, transform_indices = @transform_1, window_bounds = array<i64: 1024, 128>}, {pipeline_mode = #tpu.pipeline_mode<synchronous>, transform_indices = @transform_2, window_bounds = array<i64: 1, 128>}, {pipeline_mode = #tpu.pipeline_mode<synchronous>, transform_indices = @transform_3, window_bounds = array<i64: 128, 128>}, {pipeline_mode = #tpu.pipeline_mode<synchronous>, transform_indices = @transform_4, window_bounds = array<i64: 1, 128>}, {transform_indices = @transform_5, window_bounds = array<i64: 16, 128>}]} {
    %c0_i32 = arith.constant 0 : i32
    %0 = arith.cmpi eq, %arg1, %c0_i32 : i32
    %1 = arith.extui %0 : i1 to i32
    %c0_i32_0 = arith.constant 0 : i32
    %2 = arith.cmpi ne, %1, %c0_i32_0 : i32
    scf.if %2 {
      %cst_16 = arith.constant 0.000000e+00 : f32
      %21 = vector.broadcast %cst_16 : f32 to vector<16x128xf32>
      %c0_17 = arith.constant 0 : index
      %c0_18 = arith.constant 0 : index
      %22 = vector.load %arg8[%c0_17, %c0_18] : memref<16x128xf32, #tpu.memory_space<vmem>>, vector<16x128xf32>
      tpu.vector_store %arg8[%c0_17, %c0_18], %21 {strides = array<i32>} : memref<16x128xf32, #tpu.memory_space<vmem>>, vector<16x128xf32>,
    } else {
    }
    %c0 = arith.constant 0 : index
    %c0_1 = arith.constant 0 : index
    %3 = vector.load %arg2[%c0, %c0_1] : memref<16x1024xf32, #tpu.memory_space<vmem>>, vector<16x1024xf32>
    %4 = arith.truncf %3 : vector<16x1024xf32> to vector<16x1024xbf16>
    %c0_2 = arith.constant 0 : index
    %c0_3 = arith.constant 0 : index
    %5 = vector.load %arg3[%c0_2, %c0_3] : memref<1024x128xbf16, #tpu.memory_space<vmem>>, vector<1024x128xbf16>
    %cst = arith.constant dense<0.000000e+00> : vector<16x128xf32>
    %6 = tpu.matmul %4, %5, %cst {dimension_numbers = #tpu.dot_dimension_numbers<[1], [0], [0], [1], [0, 0, 1, 1], [], []>} : vector<16x1024xbf16>, vector<1024x128xbf16>, vector<16x128xf32> -> vector<16x128xf32>
    %c0_4 = arith.constant 0 : index
    %c0_5 = arith.constant 0 : index
    %7 = vector.load %arg4[%c0_4, %c0_5] : memref<1x128xf32, #tpu.memory_space<vmem>>, vector<1x128xf32>
    %8 = vector.broadcast %7 : vector<1x128xf32> to vector<16x128xf32>
    %9 = arith.addf %6, %8 : vector<16x128xf32>
    %cst_6 = arith.constant 0.000000e+00 : f32
    %10 = vector.broadcast %cst_6 : f32 to vector<16x128xf32>
    %11 = arith.maximumf %9, %10 : vector<16x128xf32>
    %c0_7 = arith.constant 0 : index
    %c0_8 = arith.constant 0 : index
    %12 = vector.load %arg8[%c0_7, %c0_8] : memref<16x128xf32, #tpu.memory_space<vmem>>, vector<16x128xf32>
    %13 = arith.truncf %11 : vector<16x128xf32> to vector<16x128xbf16>
    %c0_9 = arith.constant 0 : index
    %c0_10 = arith.constant 0 : index
    %14 = vector.load %arg5[%c0_9, %c0_10] : memref<128x128xbf16, #tpu.memory_space<vmem>>, vector<128x128xbf16>
    %cst_11 = arith.constant dense<0.000000e+00> : vector<16x128xf32>
    %15 = tpu.matmul %13, %14, %cst_11 {dimension_numbers = #tpu.dot_dimension_numbers<[1], [0], [0], [1], [0, 0, 1, 1], [], []>} : vector<16x128xbf16>, vector<128x128xbf16>, vector<16x128xf32> -> vector<16x128xf32>
    %16 = arith.addf %12, %15 : vector<16x128xf32>
    %c0_12 = arith.constant 0 : index
    %c0_13 = arith.constant 0 : index
    %17 = vector.load %arg8[%c0_12, %c0_13] : memref<16x128xf32, #tpu.memory_space<vmem>>, vector<16x128xf32>
    tpu.vector_store %arg8[%c0_12, %c0_13], %16 {strides = array<i32>} : memref<16x128xf32, #tpu.memory_space<vmem>>, vector<16x128xf32>,
    %c0_i32_14 = arith.constant 0 : i32
    %18 = arith.cmpi eq, %arg1, %c0_i32_14 : i32
    %19 = arith.extui %18 : i1 to i32
    %c0_i32_15 = arith.constant 0 : i32
    %20 = arith.cmpi ne, %19, %c0_i32_15 : i32
    scf.if %20 {
      %c0_16 = arith.constant 0 : index
      %c0_17 = arith.constant 0 : index
      %21 = vector.load %arg8[%c0_16, %c0_17] : memref<16x128xf32, #tpu.memory_space<vmem>>, vector<16x128xf32>
      %c0_18 = arith.constant 0 : index
      %c0_19 = arith.constant 0 : index
      %22 = vector.load %arg6[%c0_18, %c0_19] : memref<1x128xf32, #tpu.memory_space<vmem>>, vector<1x128xf32>
      %23 = vector.broadcast %22 : vector<1x128xf32> to vector<16x128xf32>
      %24 = arith.addf %21, %23 : vector<16x128xf32>
      %c0_20 = arith.constant 0 : index
      %c0_21 = arith.constant 0 : index
      %25 = vector.load %arg7[%c0_20, %c0_21] : memref<16x128xf32, #tpu.memory_space<vmem>>, vector<16x128xf32>
      tpu.vector_store %arg7[%c0_20, %c0_21], %24 {strides = array<i32>} : memref<16x128xf32, #tpu.memory_space<vmem>>, vector<16x128xf32>,
    } else {
    }
    return
  }
  func.func @transform_0(%arg0: i32, %arg1: i32) -> (i32, i32) {
    %c0_i32 = arith.constant 0 : i32
    %c0_i32_0 = arith.constant 0 : i32
    return %arg0, %c0_i32 : i32, i32
  }
  func.func @transform_1(%arg0: i32, %arg1: i32) -> (i32, i32) {
    %c0_i32 = arith.constant 0 : i32
    %c0_i32_0 = arith.constant 0 : i32
    return %c0_i32, %arg1 : i32, i32
  }
  func.func @transform_2(%arg0: i32, %arg1: i32) -> (i32, i32) {
    %c0_i32 = arith.constant 0 : i32
    %c0_i32_0 = arith.constant 0 : i32
    return %c0_i32, %arg1 : i32, i32
  }
  func.func @transform_3(%arg0: i32, %arg1: i32) -> (i32, i32) {
    %c0_i32 = arith.constant 0 : i32
    %c0_i32_0 = arith.constant 0 : i32
    return %arg1, %c0_i32 : i32, i32
  }
  func.func @transform_4(%arg0: i32, %arg1: i32) -> (i32, i32) {
    %c0_i32 = arith.constant 0 : i32
    %c0_i32_0 = arith.constant 0 : i32
    %c0_i32_1 = arith.constant 0 : i32
    return %c0_i32, %c0_i32_0 : i32, i32
  }
  func.func @transform_5(%arg0: i32, %arg1: i32) -> (i32, i32) {
    %c0_i32 = arith.constant 0 : i32
    %c0_i32_0 = arith.constant 0 : i32
    return %arg0, %c0_i32 : i32, i32
  }
}

module attributes {stable_mosaic.version = 11 : i64} {
  func.func @_mlp_kernel(%arg0: i32, %arg1: i32, %arg2: memref<16x1024xf32, #tpu.memory_space<vmem>>, %arg3: memref<1024x128xbf16, #tpu.memory_space<vmem>>, %arg4: memref<1x128xf32, #tpu.memory_space<vmem>>, %arg5: memref<128x128xbf16, #tpu.memory_space<vmem>>, %arg6: memref<1x128xf32, #tpu.memory_space<vmem>>, %arg7: memref<16x128xf32, #tpu.memory_space<vmem>>, %arg8: memref<16x128xf32, #tpu.memory_space<vmem>>) attributes {dimension_semantics = [#tpu.dimension_semantics<parallel>, #tpu.dimension_semantics<arbitrary>], iteration_bounds = array<i64: 1, 1>, scalar_prefetch = 0 : i64, scratch_operands = 1 : i64, tpu.core_type = #tpu.core_type<tc>, window_params = [{transform_indices = @transform_0, window_bounds = array<i64: 16, 1024>}, {transform_indices = @transform_1, window_bounds = array<i64: 1024, 128>}, {transform_indices = @transform_2, window_bounds = array<i64: 1, 128>}, {transform_indices = @transform_3, window_bounds = array<i64: 128, 128>}, {pipeline_mode = #tpu.pipeline_mode<synchronous>, transform_indices = @transform_4, window_bounds = array<i64: 1, 128>}, {transform_indices = @transform_5, window_bounds = array<i64: 16, 128>}]} {
    %c0_i32 = arith.constant 0 : i32
    %0 = arith.cmpi eq, %arg1, %c0_i32 : i32
    %1 = arith.extui %0 : i1 to i32
    %c0_i32_0 = arith.constant 0 : i32
    %2 = arith.cmpi ne, %1, %c0_i32_0 : i32
    scf.if %2 {
      %cst_16 = arith.constant 0.000000e+00 : f32
      %21 = vector.broadcast %cst_16 : f32 to vector<16x128xf32>
      %c0_17 = arith.constant 0 : index
      %c0_18 = arith.constant 0 : index
      %22 = vector.load %arg8[%c0_17, %c0_18] : memref<16x128xf32, #tpu.memory_space<vmem>>, vector<16x128xf32>
      tpu.vector_store %arg8[%c0_17, %c0_18], %21 {strides = array<i32>} : memref<16x128xf32, #tpu.memory_space<vmem>>, vector<16x128xf32>,
    } else {
    }
    %c0 = arith.constant 0 : index
    %c0_1 = arith.constant 0 : index
    %3 = vector.load %arg2[%c0, %c0_1] : memref<16x1024xf32, #tpu.memory_space<vmem>>, vector<16x1024xf32>
    %4 = arith.truncf %3 : vector<16x1024xf32> to vector<16x1024xbf16>
    %c0_2 = arith.constant 0 : index
    %c0_3 = arith.constant 0 : index
    %5 = vector.load %arg3[%c0_2, %c0_3] : memref<1024x128xbf16, #tpu.memory_space<vmem>>, vector<1024x128xbf16>
    %cst = arith.constant dense<0.000000e+00> : vector<16x128xf32>
    %6 = tpu.matmul %4, %5, %cst {dimension_numbers = #tpu.dot_dimension_numbers<[1], [0], [0], [1], [0, 0, 1, 1], [], []>} : vector<16x1024xbf16>, vector<1024x128xbf16>, vector<16x128xf32> -> vector<16x128xf32>
    %c0_4 = arith.constant 0 : index
    %c0_5 = arith.constant 0 : index
    %7 = vector.load %arg4[%c0_4, %c0_5] : memref<1x128xf32, #tpu.memory_space<vmem>>, vector<1x128xf32>
    %8 = vector.broadcast %7 : vector<1x128xf32> to vector<16x128xf32>
    %9 = arith.addf %6, %8 : vector<16x128xf32>
    %cst_6 = arith.constant 0.000000e+00 : f32
    %10 = vector.broadcast %cst_6 : f32 to vector<16x128xf32>
    %11 = arith.maximumf %9, %10 : vector<16x128xf32>
    %c0_7 = arith.constant 0 : index
    %c0_8 = arith.constant 0 : index
    %12 = vector.load %arg8[%c0_7, %c0_8] : memref<16x128xf32, #tpu.memory_space<vmem>>, vector<16x128xf32>
    %13 = arith.truncf %11 : vector<16x128xf32> to vector<16x128xbf16>
    %c0_9 = arith.constant 0 : index
    %c0_10 = arith.constant 0 : index
    %14 = vector.load %arg5[%c0_9, %c0_10] : memref<128x128xbf16, #tpu.memory_space<vmem>>, vector<128x128xbf16>
    %cst_11 = arith.constant dense<0.000000e+00> : vector<16x128xf32>
    %15 = tpu.matmul %13, %14, %cst_11 {dimension_numbers = #tpu.dot_dimension_numbers<[1], [0], [0], [1], [0, 0, 1, 1], [], []>} : vector<16x128xbf16>, vector<128x128xbf16>, vector<16x128xf32> -> vector<16x128xf32>
    %16 = arith.addf %12, %15 : vector<16x128xf32>
    %c0_12 = arith.constant 0 : index
    %c0_13 = arith.constant 0 : index
    %17 = vector.load %arg8[%c0_12, %c0_13] : memref<16x128xf32, #tpu.memory_space<vmem>>, vector<16x128xf32>
    tpu.vector_store %arg8[%c0_12, %c0_13], %16 {strides = array<i32>} : memref<16x128xf32, #tpu.memory_space<vmem>>, vector<16x128xf32>,
    %c0_i32_14 = arith.constant 0 : i32
    %18 = arith.cmpi eq, %arg1, %c0_i32_14 : i32
    %19 = arith.extui %18 : i1 to i32
    %c0_i32_15 = arith.constant 0 : i32
    %20 = arith.cmpi ne, %19, %c0_i32_15 : i32
    scf.if %20 {
      %c0_16 = arith.constant 0 : index
      %c0_17 = arith.constant 0 : index
      %21 = vector.load %arg8[%c0_16, %c0_17] : memref<16x128xf32, #tpu.memory_space<vmem>>, vector<16x128xf32>
      %c0_18 = arith.constant 0 : index
      %c0_19 = arith.constant 0 : index
      %22 = vector.load %arg6[%c0_18, %c0_19] : memref<1x128xf32, #tpu.memory_space<vmem>>, vector<1x128xf32>
      %23 = vector.broadcast %22 : vector<1x128xf32> to vector<16x128xf32>
      %24 = arith.addf %21, %23 : vector<16x128xf32>
      %c0_20 = arith.constant 0 : index
      %c0_21 = arith.constant 0 : index
      %25 = vector.load %arg7[%c0_20, %c0_21] : memref<16x128xf32, #tpu.memory_space<vmem>>, vector<16x128xf32>
      tpu.vector_store %arg7[%c0_20, %c0_21], %24 {strides = array<i32>} : memref<16x128xf32, #tpu.memory_space<vmem>>, vector<16x128xf32>,
    } else {
    }
    return
  }
  func.func @transform_0(%arg0: i32, %arg1: i32) -> (i32, i32) {
    %c0_i32 = arith.constant 0 : i32
    %c0_i32_0 = arith.constant 0 : i32
    return %arg0, %c0_i32 : i32, i32
  }
  func.func @transform_1(%arg0: i32, %arg1: i32) -> (i32, i32) {
    %c0_i32 = arith.constant 0 : i32
    %c0_i32_0 = arith.constant 0 : i32
    return %c0_i32, %arg1 : i32, i32
  }
  func.func @transform_2(%arg0: i32, %arg1: i32) -> (i32, i32) {
    %c0_i32 = arith.constant 0 : i32
    %c0_i32_0 = arith.constant 0 : i32
    return %c0_i32, %arg1 : i32, i32
  }
  func.func @transform_3(%arg0: i32, %arg1: i32) -> (i32, i32) {
    %c0_i32 = arith.constant 0 : i32
    %c0_i32_0 = arith.constant 0 : i32
    return %arg1, %c0_i32 : i32, i32
  }
  func.func @transform_4(%arg0: i32, %arg1: i32) -> (i32, i32) {
    %c0_i32 = arith.constant 0 : i32
    %c0_i32_0 = arith.constant 0 : i32
    %c0_i32_1 = arith.constant 0 : i32
    return %c0_i32, %c0_i32_0 : i32, i32
  }
  func.func @transform_5(%arg0: i32, %arg1: i32) -> (i32, i32) {
    %c0_i32 = arith.constant 0 : i32
    %c0_i32_0 = arith.constant 0 : i32
    return %arg0, %c0_i32 : i32, i32
  }
}

</mosaic_0001>

<bundles_post_ra>
// kernel: tpu_custom_call.1
= control target key start
LH: loop header
LB: loop body
LE: loop exit
PB: predicated region body
PF: predicated region fallthrough
CT: control target
= control target key end

     0   :  { %10 = vsyncpa [#allocation4], 0  ;;  %s1394_s0 = inlined_call_operand.hbm [shape: f32[16,1024], index: 0, kind: input, shape index: {}]   ;;  %s1395_s1 = inlined_call_operand.hbm [shape: bf16[1024,128], index: 1, kind: input, shape index: {}]   ;;  %s1396_s2 = inlined_call_operand.vmem [shape: f32[1,128], index: 2, kind: input, shape index: {}]   ;;  %s1397_s3 = inlined_call_operand.hbm [shape: bf16[128,128], index: 3, kind: input, shape index: {}]   ;;  %s1398_s4 = inlined_call_operand.vmem [shape: f32[1,128], index: 4, kind: input, shape index: {}]   ;;  %s1399_s5 = inlined_call_operand.hbm [shape: f32[16,128], index: 5, kind: output, shape index: {}]  }
   0x1   :  { %11 = vsyncpa [#allocation7], 0 }
   0x2   :  { %12 = vsyncpa [#allocation5], 0  ;;  %s1292_s18 = smov [#allocation6]   ;;  %s1198_s22 = scalar_lea.hbm %s1395_s1, 8192 }
   0x3   :  { %s30_s19 = sshll.u32 %s1292_s18, 4  ;;  %p1199_p0 = scmp.ne.s32.totalorder %s1395_s1, %s1198_s22  ;;  %s31_s19 = int_to_ptr.vmem [resolvable:$true] %s30_s19 }
   0x4   :  { %p1202_p1 = scmp.lt.u32.totalorder %s1198_s22, %s1395_s1 }
   0x6   :  { %p1204_p2 = pnand %p1202_p1, %p1199_p0 }
   0x8   :  { %1207 = shalt.err (!%p1204_p2)
}
   0x9   :  { %s1208_s27 = scalar_lea.vmem %s31_s19, 8192  ;;  %p1213_p4 = scmp.lt.s32.totalorder %s31_s19, %s31_s19 }
   0xa   :  { %p1209_p3 = scmp.ne.s32.totalorder %s31_s19, %s1208_s27  ;;  %p1214_p5 = scmp.lt.s32.totalorder %s1208_s27, %s1208_s27 }
   0xc   :  { %p1215_p6 = por %p1214_p5, %p1213_p4 }
   0xe   :  { %p1216_p7 = pnand %p1215_p6, %p1209_p3 }
  0x10   :  { %1219 = shalt.err (!%p1216_p7)
}
  0x11   :  { %s1293_s28 = smov 64   ;;  %s1294_s29 = smov 4  }
  0x12   :  { %36 = dma.hbm_to_vmem [thread:$0]  %s1395_s1, 8192, %s31_s19, [#allocation7], %s1293_s28, %s1293_s28, %s1294_s29  }
  0x13   :  { %s1295_s7 = smov [#allocation3]   ;;  %s1220_s11 = scalar_lea.hbm %s1394_s0, 2048 }
  0x14   :  { %s18_s8 = sshll.u32 %s1295_s7, 4  ;;  %p1221_p8 = scmp.ne.s32.totalorder %s1394_s0, %s1220_s11  ;;  %s19_s8 = int_to_ptr.vmem [resolvable:$true] %s18_s8 }
  0x15   :  { %p1224_p9 = scmp.lt.u32.totalorder %s1220_s11, %s1394_s0 }
  0x17   :  { %p1226_p10 = pnand %p1224_p9, %p1221_p8 }
  0x19   :  { %1229 = shalt.err (!%p1226_p10)
}
  0x1a   :  { %s1230_s16 = scalar_lea.vmem %s19_s8, 2048  ;;  %p1235_p12 = scmp.lt.s32.totalorder %s19_s8, %s19_s8 }
  0x1b   :  { %p1231_p11 = scmp.ne.s32.totalorder %s19_s8, %s1230_s16  ;;  %p1236_p13 = scmp.lt.s32.totalorder %s1230_s16, %s1230_s16 }
  0x1d   :  { %p1237_p0 = por %p1236_p13, %p1235_p12 }
  0x1f   :  { %p1238_p1 = pnand %p1237_p0, %p1231_p11 }
  0x21   :  { %1241 = shalt.err (!%p1238_p1)
}
  0x22   :  { %s1296_s1 = smov 1024   ;;  %s1297_s19 = smov [#allocation8]  }
  0x23   :  { %24 = dma.hbm_to_vmem [thread:$0]  %s1394_s0, 2048, %s19_s8, [#allocation4], %s1296_s1, %s1296_s1, %s1293_s28  }
  0x24   :  { %s44_s20 = sshll.u32 %s1297_s19, 4  ;;  %s1242_s23 = scalar_lea.hbm %s1397_s3, 1024  ;;  %s45_s20 = int_to_ptr.vmem [resolvable:$true] %s44_s20 }
  0x25   :  { %p1243_p2 = scmp.ne.s32.totalorder %s1397_s3, %s1242_s23  ;;  %p1246_p3 = scmp.lt.u32.totalorder %s1242_s23, %s1397_s3 }
  0x27   :  { %p1248_p4 = pnand %p1246_p3, %p1243_p2 }
  0x29   :  { %1251 = shalt.err (!%p1248_p4)
}
  0x2a   :  { %s1252_s30 = scalar_lea.vmem %s45_s20, 1024  ;;  %p1257_p6 = scmp.lt.s32.totalorder %s45_s20, %s45_s20 }
  0x2b   :  { %p1253_p5 = scmp.ne.s32.totalorder %s45_s20, %s1252_s30  ;;  %p1258_p7 = scmp.lt.s32.totalorder %s1252_s30, %s1252_s30 }
  0x2d   :  { %p1259_p8 = por %p1258_p7, %p1257_p6 }
  0x2f   :  { %p1260_p9 = pnand %p1259_p8, %p1253_p5 }
  0x31   :  { %1263 = shalt.err (!%p1260_p9)
}
  0x32   :  { %50 = dma.hbm_to_vmem [thread:$0]  %s1397_s3, 1024, %s45_s20, [#allocation7], %s1293_s28, %s1293_s28, %s1294_s29  }
  0x33   :  { %1286 = dma.done.wait [#allocation4], 2048  }
  0x34   :  { %1287 = vsyncadd [#allocation4], 4294965248 }
  0x35   :  { %1288 = dma.done.wait [#allocation7], 9216  }
  0x36   :  { %1289 = vsyncadd [#allocation7], 4294958080  ;;  %v1126_v0 = vld [vmem:[#allocation6 + $0x40] sm:$0xff]   ;;  %v1130_v4 = vld [vmem:[#allocation6 + $0x48] sm:$0xff]   ;;  %vm1299_vm0 = vmmov 0   ;;  %s1300_s7 = smov [#allocation9]  }
  0x37   :  { %v1127_v1 = vld [vmem:[#allocation6 + $0xc0] sm:$0xff]   ;;  %998 = vmatprep.subr.bf16.mxu0 %v1126_v0  ;;  %v1131_v5 = vld [vmem:[#allocation6 + $0xc8] sm:$0xff]   ;;  %v1134_v8 = vld [vmem:[#allocation6 + $0x50] sm:$0xff]   ;;  %s911_s8 = sshll.u32 %s1300_s7, 4  ;;  %s912_s8 = int_to_ptr.vmem [resolvable:$true] %s911_s8 }
  0x38   :  { %v1128_v2 = vld [vmem:[#allocation6] sm:$0xff]   ;;  %1020 = vmatprep.subr.bf16.mxu1 %v1127_v1  ;;  %v1132_v6 = vld [vmem:[#allocation6 + $0x8] sm:$0xff]   ;;  %v1135_v9 = vld [vmem:[#allocation6 + $0xd0] sm:$0xff]   ;;  %s1264_s9 = scalar_lea.vmem %s912_s8, 256  ;;  %p1269_p11 = scmp.lt.s32.totalorder %s912_s8, %s912_s8 }
  0x39   :  { %v1129_v3 = vld [vmem:[#allocation6 + $0x80] sm:$0xff]   ;;  %999 = vmatpush3.bf16.msra.mxu0 %v1128_v2  ;;  %v1133_v7 = vld [vmem:[#allocation6 + $0x88] sm:$0xff]   ;;  %v1136_v10 = vld [vmem:[#allocation6 + $0x10] sm:$0xff]   ;;  %p1265_p10 = scmp.ne.s32.totalorder %s912_s8, %s1264_s9  ;;  %p1270_p12 = scmp.lt.s32.totalorder %s1264_s9, %s1264_s9 }
  0x3a   :  { %1021 = vmatpush3.bf16.msra.mxu1 %v1129_v3  ;;  %1000 = vmatprep.subr.bf16.mxu0 %v1130_v4  ;;  %v1137_v11 = vld [vmem:[#allocation6 + $0x90] sm:$0xff]   ;;  %v1138_v12 = vld [vmem:[#allocation6 + $0x58] sm:$0xff]   ;;  %v1142_v16 = vld [vmem:[#allocation6 + $0x60] sm:$0xff]  }
  0x3b   :  { %1022 = vmatprep.subr.bf16.mxu1 %v1131_v5  ;;  %v1139_v13 = vld [vmem:[#allocation6 + $0xd8] sm:$0xff]   ;;  %v1143_v17 = vld [vmem:[#allocation6 + $0xe0] sm:$0xff]   ;;  %v1146_v20 = vld [vmem:[#allocation6 + $0x68] sm:$0xff]   ;;  %p1271_p13 = por %p1270_p12, %p1269_p11 }
  0x3c   :  { %v1140_v14 = vld [vmem:[#allocation6 + $0x18] sm:$0xff]   ;;  %v1144_v18 = vld [vmem:[#allocation6 + $0x20] sm:$0xff]   ;;  %v1147_v21 = vld [vmem:[#allocation6 + $0xe8] sm:$0xff]  }
  0x3d   :  { %1001 = vmatpush3.bf16.msra.mxu0 %v1132_v6  ;;  %v1141_v15 = vld [vmem:[#allocation6 + $0x98] sm:$0xff]   ;;  %v1145_v19 = vld [vmem:[#allocation6 + $0xa0] sm:$0xff]   ;;  %v1148_v22 = vld [vmem:[#allocation6 + $0x28] sm:$0xff]   ;;  %p1272_p0 = pnand %p1271_p13, %p1265_p10 }
  0x3e   :  { %1023 = vmatpush3.bf16.msra.mxu1 %v1133_v7  ;;  %1002 = vmatprep.subr.bf16.mxu0 %v1134_v8  ;;  %v1149_v23 = vld [vmem:[#allocation6 + $0xa8] sm:$0xff]   ;;  %v1150_v24 = vld [vmem:[#allocation6 + $0x70] sm:$0xff]   ;;  %v1154_v28 = vld [vmem:[#allocation6 + $0x78] sm:$0xff]  }
  0x3f   :  { %1024 = vmatprep.subr.bf16.mxu1 %v1135_v9  ;;  %v1151_v25 = vld [vmem:[#allocation6 + $0xf0] sm:$0xff]   ;;  %v1155_v29 = vld [vmem:[#allocation6 + $0xf8] sm:$0xff]   ;;  %v70_v32 = vld [vmem:[#allocation3 + $0x8] sm:$0xff] }
  0x40   :  { %v1152_v26 = vld [vmem:[#allocation6 + $0x30] sm:$0xff]   ;;  %v1156_v30 = vld [vmem:[#allocation6 + $0x38] sm:$0xff]   ;;  %v78_v33 = vld [vmem:[#allocation3 + $0x48] sm:$0xff] }
  0x41   :  { %1003 = vmatpush3.bf16.msra.mxu0 %v1136_v10  ;;  %v1153_v27 = vld [vmem:[#allocation6 + $0xb0] sm:$0xff]   ;;  %v1157_v31 = vld [vmem:[#allocation6 + $0xb8] sm:$0xff]   ;;  %v86_v35 = vpack.c.bf16 %v78_v33, %v70_v32  ;;  %v69_v37 = vld [vmem:[#allocation3] sm:$0xff] }
  0x42   :  { %1025 = vmatpush3.bf16.msra.mxu1 %v1137_v11  ;;  %1004 = vmatprep.subr.bf16.mxu0 %v1138_v12  ;;  %v72_v34 = vld [vmem:[#allocation3 + $0x18] sm:$0xff]  ;;  %v77_v38 = vld [vmem:[#allocation3 + $0x40] sm:$0xff]  ;;  %v71_v41 = vld [vmem:[#allocation3 + $0x10] sm:$0xff] }
  0x43   :  { %1026 = vmatprep.subr.bf16.mxu1 %v1139_v13  ;;  %v80_v36 = vld [vmem:[#allocation3 + $0x58] sm:$0xff]  ;;  %v85_v40 = vpack.c.bf16 %v77_v38, %v69_v37  ;;  %v79_v42 = vld [vmem:[#allocation3 + $0x50] sm:$0xff]  ;;  %644 = vmatprep.mubr.bf16.mxu0 %v86_v35  ;;  %v1158_v44 = vld [vmem:[#allocation6 + $0x140] sm:$0xff]  }
  0x44   :  { %v88_v39 = vpack.c.bf16 %v80_v36, %v72_v34  ;;  %v87_v43 = vpack.c.bf16 %v79_v42, %v71_v41  ;;  %v1159_v45 = vld [vmem:[#allocation6 + $0x1c0] sm:$0xff]   ;;  %v1162_v48 = vld [vmem:[#allocation6 + $0x148] sm:$0xff]   ;;  %v1166_v52 = vld [vmem:[#allocation6 + $0x150] sm:$0xff]  }
  0x45   :  { %1005 = vmatpush3.bf16.msra.mxu0 %v1140_v14  ;;  %v1160_v46 = vld [vmem:[#allocation6 + $0x100] sm:$0xff]   ;;  %v1163_v49 = vld [vmem:[#allocation6 + $0x1c8] sm:$0xff]   ;;  %v1167_v53 = vld [vmem:[#allocation6 + $0x1d0] sm:$0xff]  }
  0x46   :  { %1027 = vmatpush3.bf16.msra.mxu1 %v1141_v15  ;;  %1006 = vmatprep.subr.bf16.mxu0 %v1142_v16  ;;  %v1161_v47 = vld [vmem:[#allocation6 + $0x180] sm:$0xff]   ;;  %v1164_v50 = vld [vmem:[#allocation6 + $0x108] sm:$0xff]   ;;  %v1168_v54 = vld [vmem:[#allocation6 + $0x110] sm:$0xff]  }
  0x47   :  { %1028 = vmatprep.subr.bf16.mxu1 %v1143_v17  ;;  %685 = vmatprep.mubr.bf16.mxu1 %v88_v39  ;;  %v1165_v51 = vld [vmem:[#allocation6 + $0x188] sm:$0xff]   ;;  %v1169_v55 = vld [vmem:[#allocation6 + $0x190] sm:$0xff]   ;;  %v1170_v56 = vld [vmem:[#allocation6 + $0x158] sm:$0xff]  }
  0x48   :  { %v1171_v57 = vld [vmem:[#allocation6 + $0x1d8] sm:$0xff]   ;;  %v1174_v60 = vld [vmem:[#allocation6 + $0x160] sm:$0xff]   ;;  %v1178_v0 = vld [vmem:[#allocation6 + $0x168] sm:$0xff]  }
  0x49   :  { %1007 = vmatpush3.bf16.msra.mxu0 %v1144_v18  ;;  %v1172_v58 = vld [vmem:[#allocation6 + $0x118] sm:$0xff]   ;;  %v1175_v61 = vld [vmem:[#allocation6 + $0x1e0] sm:$0xff]   ;;  %v1179_v1 = vld [vmem:[#allocation6 + $0x1e8] sm:$0xff]  }
  0x4a   :  { %1029 = vmatpush3.bf16.msra.mxu1 %v1145_v19  ;;  %1008 = vmatprep.subr.bf16.mxu0 %v1146_v20  ;;  %v1173_v59 = vld [vmem:[#allocation6 + $0x198] sm:$0xff]   ;;  %v1176_v62 = vld [vmem:[#allocation6 + $0x120] sm:$0xff]   ;;  %v1180_v2 = vld [vmem:[#allocation6 + $0x128] sm:$0xff]  }
  0x4b   :  { %1030 = vmatprep.subr.bf16.mxu1 %v1147_v21  ;;  %v1177_v63 = vld [vmem:[#allocation6 + $0x1a0] sm:$0xff]   ;;  %v1181_v3 = vld [vmem:[#allocation6 + $0x1a8] sm:$0xff]   ;;  %v1182_v4 = vld [vmem:[#allocation6 + $0x170] sm:$0xff]  }
  0x4c   :  { %v1183_v5 = vld [vmem:[#allocation6 + $0x1f0] sm:$0xff]   ;;  %v1186_v8 = vld [vmem:[#allocation6 + $0x178] sm:$0xff]   ;;  %v74_v12 = vld [vmem:[#allocation3 + $0x28] sm:$0xff] }
  0x4d   :  { %1009 = vmatpush3.bf16.msra.mxu0 %v1148_v22  ;;  %v1184_v6 = vld [vmem:[#allocation6 + $0x130] sm:$0xff]   ;;  %v1187_v9 = vld [vmem:[#allocation6 + $0x1f8] sm:$0xff]   ;;  %v82_v13 = vld [vmem:[#allocation3 + $0x68] sm:$0xff] }
  0x4e   :  { %1031 = vmatpush3.bf16.msra.mxu1 %v1149_v23  ;;  %1010 = vmatprep.subr.bf16.mxu0 %v1150_v24  ;;  %v1185_v7 = vld [vmem:[#allocation6 + $0x1b0] sm:$0xff]   ;;  %v1188_v10 = vld [vmem:[#allocation6 + $0x138] sm:$0xff]   ;;  %v90_v16 = vpack.c.bf16 %v82_v13, %v74_v12  ;;  %v73_v18 = vld [vmem:[#allocation3 + $0x20] sm:$0xff] }
  0x4f   :  { %1032 = vmatprep.subr.bf16.mxu1 %v1151_v25  ;;  %v1189_v11 = vld [vmem:[#allocation6 + $0x1b8] sm:$0xff]   ;;  %v81_v19 = vld [vmem:[#allocation3 + $0x60] sm:$0xff]  ;;  %v75_v20 = vld [vmem:[#allocation3 + $0x30] sm:$0xff]  ;;  %v1298_v25 = vmov 0.0  }
  0x50   :  { %v76_v14 = vld [vmem:[#allocation3 + $0x38] sm:$0xff]  ;;  %v89_v21 = vpack.c.bf16 %v81_v19, %v73_v18  ;;  %v83_v22 = vld [vmem:[#allocation3 + $0x70] sm:$0xff]  ;;  %v1190_v24 = vld [vmem:[#allocation8] sm:$0xff]  }
  0x51   :  { %1011 = vmatpush3.bf16.msra.mxu0 %v1152_v26  ;;  %v84_v15 = vld [vmem:[#allocation3 + $0x78] sm:$0xff]  ;;  %v91_v23 = vpack.c.bf16 %v83_v22, %v75_v20  ;;  %v1191_v26 = vld [vmem:[#allocation8 + $0x8] sm:$0xff]   ;;  %v924_v35 = vld [vmem:[%s1396_s2] ss:$0 sm:$0xff] }
  0x52   :  { %1033 = vmatpush3.bf16.msra.mxu1 %v1153_v27  ;;  %1012 = vmatprep.subr.bf16.mxu0 %v1154_v28  ;;  %v92_v17 = vpack.c.bf16 %v84_v15, %v76_v14  ;;  %v1192_v27 = vld [vmem:[#allocation8 + $0x10] sm:$0xff]   ;;  %v1193_v28 = vld [vmem:[#allocation8 + $0x18] sm:$0xff]  }
  0x53   :  { %1034 = vmatprep.subr.bf16.mxu1 %v1155_v29  ;;  %v1194_v29 = vld [vmem:[#allocation8 + $0x20] sm:$0xff]   ;;  %v1197_v32 = vld [vmem:[#allocation8 + $0x38] sm:$0xff]  }
  0x55   :  { %1013 = vmatpush3.bf16.msra.mxu0 %v1156_v30  ;;  %v1195_v30 = vld [vmem:[#allocation8 + $0x28] sm:$0xff]  }
  0x56   :  { %1035 = vmatpush3.bf16.msra.mxu1 %v1157_v31  ;;  %1042 = vmatprep.subr.bf16.mxu0 %v1158_v44  ;;  %v1196_v31 = vld [vmem:[#allocation8 + $0x30] sm:$0xff]  }
  0x57   :  { %1064 = vmatprep.subr.bf16.mxu1 %v1159_v45 }
  0x58   :  { %645 = vmatmul.mubr.bf16.vlgmr.msra.gmra.mrb[0].mxu0 %v85_v40 }
  0x59   :  { %686 = vmatmul.mubr.bf16.vlgmr.msra.gmra.mrb[0].mxu1 %v87_v43  ;;  %1043 = vmatpush3.bf16.msra.mxu0 %v1160_v46 }
  0x5a   :  { %1065 = vmatpush3.bf16.msra.mxu1 %v1161_v47  ;;  %1044 = vmatprep.subr.bf16.mxu0 %v1162_v48 }
  0x5b   :  { %1066 = vmatprep.subr.bf16.mxu1 %v1163_v49  ;;  %726 = vmatprep.mubr.bf16.mxu0 %v90_v16 }
  0x5c   :  { %767 = vmatprep.mubr.bf16.mxu1 %v92_v17 }
  0x5d   :  { %1045 = vmatpush3.bf16.msra.mxu0 %v1164_v50 }
  0x5e   :  { %1067 = vmatpush3.bf16.msra.mxu1 %v1165_v51  ;;  %1046 = vmatprep.subr.bf16.mxu0 %v1166_v52 }
  0x5f   :  { %1068 = vmatprep.subr.bf16.mxu1 %v1167_v53 }
  0x61   :  { %1047 = vmatpush3.bf16.msra.mxu0 %v1168_v54 }
  0x62   :  { %1069 = vmatpush3.bf16.msra.mxu1 %v1169_v55  ;;  %1048 = vmatprep.subr.bf16.mxu0 %v1170_v56 }
  0x63   :  { %1070 = vmatprep.subr.bf16.mxu1 %v1171_v57 }
  0x65   :  { %1049 = vmatpush3.bf16.msra.mxu0 %v1172_v58 }
  0x66   :  { %1071 = vmatpush3.bf16.msra.mxu1 %v1173_v59  ;;  %1050 = vmatprep.subr.bf16.mxu0 %v1174_v60 }
  0x67   :  { %1072 = vmatprep.subr.bf16.mxu1 %v1175_v61 }
  0x69   :  { %1051 = vmatpush3.bf16.msra.mxu0 %v1176_v62 }
  0x6a   :  { %1073 = vmatpush3.bf16.msra.mxu1 %v1177_v63  ;;  %1052 = vmatprep.subr.bf16.mxu0 %v1178_v0 }
  0x6b   :  { %1074 = vmatprep.subr.bf16.mxu1 %v1179_v1 }
  0x6d   :  { %1053 = vmatpush3.bf16.msra.mxu0 %v1180_v2 }
  0x6e   :  { %1075 = vmatpush3.bf16.msra.mxu1 %v1181_v3  ;;  %1054 = vmatprep.subr.bf16.mxu0 %v1182_v4 }
  0x6f   :  { %1076 = vmatprep.subr.bf16.mxu1 %v1183_v5  ;;  %v997_v5 = vld [vmem:[%s1398_s4] ss:$0 sm:$0xff] }
  0x71   :  { %1055 = vmatpush3.bf16.msra.mxu0 %v1184_v6 }
  0x72   :  { %1077 = vmatpush3.bf16.msra.mxu1 %v1185_v7  ;;  %1056 = vmatprep.subr.bf16.mxu0 %v1186_v8 }
  0x73   :  { %1078 = vmatprep.subr.bf16.mxu1 %v1187_v9 }
  0x75   :  { %1057 = vmatpush3.bf16.msra.mxu0 %v1188_v10 }
  0x76   :  { %1079 = vmatpush3.bf16.msra.mxu1 %v1189_v11  ;;  %1095 = vmatprep.subr.bf16.mxu0 %v1298_v25 }
  0x78   :  { %727 = vmatmul.mubr.bf16.vlgmr.msra.gmra.mrb[4].mxu0 %v89_v21 }
  0x79   :  { %768 = vmatmul.mubr.bf16.vlgmr.msra.gmra.mrb[4].mxu1 %v91_v23  ;;  %1096 = vmatpush3.bf16.msra.mxu0 %v1190_v24 }
  0x7a   :  { %1097 = vmatprep.subr.bf16.mxu0 %v1298_v25  ;;  %1111 = vmatprep.mubr.msk.bf16.mxu0 %vm1299_vm0, %v1298_v25 }
  0x7d   :  { %1098 = vmatpush3.bf16.msra.mxu0 %v1191_v26 }
  0x7e   :  { %1099 = vmatprep.subr.bf16.mxu0 %v1298_v25 }
  0x81   :  { %1100 = vmatpush3.bf16.msra.mxu0 %v1192_v27 }
  0x82   :  { %1101 = vmatprep.subr.bf16.mxu0 %v1298_v25 }
  0x85   :  { %1102 = vmatpush3.bf16.msra.mxu0 %v1193_v28 }
  0x86   :  { %1103 = vmatprep.subr.bf16.mxu0 %v1298_v25 }
  0x89   :  { %1104 = vmatpush3.bf16.msra.mxu0 %v1194_v29 }
  0x8a   :  { %1105 = vmatprep.subr.bf16.mxu0 %v1298_v25 }
  0x8d   :  { %1106 = vmatpush3.bf16.msra.mxu0 %v1195_v30 }
  0x8e   :  { %1107 = vmatprep.subr.bf16.mxu0 %v1298_v25 }
  0x91   :  { %1108 = vmatpush3.bf16.msra.mxu0 %v1196_v31 }
  0x92   :  { %1109 = vmatprep.subr.bf16.mxu0 %v1298_v25 }
  0x95   :  { %1110 = vmatpush3.bf16.msra.mxu0 %v1197_v32 }
 0x12b   :  { %v1014_v33 = vpop.f32.mrb[0].mxu0 }
 0x12c   :  { %v1036_v34 = vpop.f32.mrb[0].mxu1  ;;  %v1015_v36 = vpop.f32.mrb[1].mxu0 }
 0x12d   :  { %v1016_v37 = vadd.f32 %v1015_v36, %v1014_v33  ;;  %v1037_v38 = vpop.f32.mrb[1].mxu1  ;;  %v1017_v39 = vpop.f32.mrb[2].mxu0 }
 0x12e   :  { %v1038_v40 = vadd.f32 %v1037_v38, %v1036_v34  ;;  %v1039_v41 = vpop.f32.mrb[2].mxu1  ;;  %v1018_v42 = vpop.f32.mrb[3].mxu0 }
 0x12f   :  { %v647_v43 = vadd.f32 %v1016_v37, %v924_v35  ;;  %v1019_v44 = vadd.f32 %v1018_v42, %v1017_v39  ;;  %v1040_v45 = vpop.f32.mrb[3].mxu1 }
 0x130   :  { %v1041_v46 = vadd.f32 %v1040_v45, %v1039_v41 }
 0x131   :  { %v688_v47 = vadd.f32 %v1038_v40, %v647_v43  ;;  %v650_v48 = vadd.f32 %v1019_v44, %v924_v35 }
 0x133   :  { %v691_v49 = vadd.f32 %v1041_v46, %v650_v48 }
 0x14b   :  { %v1058_v50 = vpop.f32.mrb[4].mxu0 }
 0x14c   :  { %v1080_v51 = vpop.f32.mrb[4].mxu1  ;;  %v1059_v52 = vpop.f32.mrb[5].mxu0 }
 0x14d   :  { %v1060_v53 = vadd.f32 %v1059_v52, %v1058_v50  ;;  %v1081_v54 = vpop.f32.mrb[5].mxu1  ;;  %v1061_v55 = vpop.f32.mrb[6].mxu0 }
 0x14e   :  { %v1082_v56 = vadd.f32 %v1081_v54, %v1080_v51  ;;  %v1083_v57 = vpop.f32.mrb[6].mxu1  ;;  %v1062_v58 = vpop.f32.mrb[7].mxu0 }
 0x14f   :  { %v729_v59 = vadd.f32 %v1060_v53, %v688_v47  ;;  %v1063_v60 = vadd.f32 %v1062_v58, %v1061_v55  ;;  %v1084_v61 = vpop.f32.mrb[7].mxu1 }
 0x150   :  { %v1085_v62 = vadd.f32 %v1084_v61, %v1083_v57 }
 0x151   :  { %v770_v63 = vadd.f32 %v1082_v56, %v729_v59  ;;  %v732_v0 = vadd.f32 %v1063_v60, %v691_v49 }
 0x153   :  { %v773_v1 = vadd.f32 %v1085_v62, %v732_v0  ;;  %v776_v2 = vmax.f32 %v770_v63, 0.0 }
 0x155   :  { %v777_v3 = vmax.f32 %v773_v1, 0.0 }
 0x157   :  { %v780_v4 = vpack.c.bf16 %v777_v3, %v776_v2 }
 0x159   :  { %1112 = vmatmul.mubr.bf16.vlgmr.msra.gmra.mrb[8].mxu0 %v780_v4 }
 0x22c   :  { %v879_v6 = vpop.f32.mrb[8].mxu0 }
 0x22d   :  { %v902_v7 = vadd.f32 %v997_v5, %v879_v6  ;;  %v1113_v8 = vpop.f32.mrb[9].mxu0 }
 0x22e   :  { %v882_v9 = vpop.f32.mrb[10].mxu0 }
 0x22f   :  { %904 = vst [vmem:[#allocation9] sm:$0xff] %v902_v7  ;;  %v903_v10 = vadd.f32 %v997_v5, %v882_v9  ;;  %v1114_v11 = vpop.f32.mrb[11].mxu0 }
 0x231   :  { %905 = vst [vmem:[#allocation9 + $0x8] sm:$0xff] %v903_v10 }
 0x232   :  { %1275 = shalt.err (!%p1272_p0)
}
 0x233   :  { %s1276_s11 = scalar_lea.hbm %s1399_s5, 256 }
 0x234   :  { %p1277_p1 = scmp.ne.s32.totalorder %s1399_s5, %s1276_s11  ;;  %p1280_p2 = scmp.lt.u32.totalorder %s1276_s11, %s1399_s5 }
 0x236   :  { %p1282_p3 = pnand %p1280_p2, %p1277_p1 }
 0x238   :  { %1285 = shalt.err (!%p1282_p3)
}
 0x239   :  { %s1301_s16 = smov 128   ;;  %s1302_s1 = smov 8  }
 0x23a   :  { %917 = dma.vmem_to_hbm [thread:$0]  %s912_s8, 256, %s1399_s5, [#allocation5], %s1301_s16, %s1301_s16, %s1302_s1  }
 0x23b   :  { %1290 = dma.done.wait [#allocation5], 256  }
 0x23c   :  { %1291 = vsyncadd [#allocation5], 4294967040 }
 0x23d   :  { %921 = vsyncpa [#allocation4], 1 }
 0x23e   :  { %922 = vsyncpa [#allocation7], 1 }
 0x23f   :  { %923 = vsyncpa [#allocation5], 1 }

// kernel: tpu_custom_call.1
= control target key start
LH: loop header
LB: loop body
LE: loop exit
PB: predicated region body
PF: predicated region fallthrough
CT: control target
= control target key end

     0   :  { %10 = vsyncpa [#allocation4], 0  ;;  %s1394_s0 = inlined_call_operand.hbm [shape: f32[16,1024], index: 0, kind: input, shape index: {}]   ;;  %s1395_s1 = inlined_call_operand.hbm [shape: bf16[1024,128], index: 1, kind: input, shape index: {}]   ;;  %s1396_s2 = inlined_call_operand.vmem [shape: f32[1,128], index: 2, kind: input, shape index: {}]   ;;  %s1397_s3 = inlined_call_operand.hbm [shape: bf16[128,128], index: 3, kind: input, shape index: {}]   ;;  %s1398_s4 = inlined_call_operand.vmem [shape: f32[1,128], index: 4, kind: input, shape index: {}]   ;;  %s1399_s5 = inlined_call_operand.hbm [shape: f32[16,128], index: 5, kind: output, shape index: {}]  }
   0x1   :  { %11 = vsyncpa [#allocation7], 0 }
   0x2   :  { %12 = vsyncpa [#allocation5], 0  ;;  %s1292_s18 = smov [#allocation6]   ;;  %s1198_s22 = scalar_lea.hbm %s1395_s1, 8192 }
   0x3   :  { %s30_s19 = sshll.u32 %s1292_s18, 4  ;;  %p1199_p0 = scmp.ne.s32.totalorder %s1395_s1, %s1198_s22  ;;  %s31_s19 = int_to_ptr.vmem [resolvable:$true] %s30_s19 }
   0x4   :  { %p1202_p1 = scmp.lt.u32.totalorder %s1198_s22, %s1395_s1 }
   0x6   :  { %p1204_p2 = pnand %p1202_p1, %p1199_p0 }
   0x8   :  { %1207 = shalt.err (!%p1204_p2)
}
   0x9   :  { %s1208_s27 = scalar_lea.vmem %s31_s19, 8192  ;;  %p1213_p4 = scmp.lt.s32.totalorder %s31_s19, %s31_s19 }
   0xa   :  { %p1209_p3 = scmp.ne.s32.totalorder %s31_s19, %s1208_s27  ;;  %p1214_p5 = scmp.lt.s32.totalorder %s1208_s27, %s1208_s27 }
   0xc   :  { %p1215_p6 = por %p1214_p5, %p1213_p4 }
   0xe   :  { %p1216_p7 = pnand %p1215_p6, %p1209_p3 }
  0x10   :  { %1219 = shalt.err (!%p1216_p7)
}
  0x11   :  { %s1293_s28 = smov 64   ;;  %s1294_s29 = smov 4  }
  0x12   :  { %36 = dma.hbm_to_vmem [thread:$0]  %s1395_s1, 8192, %s31_s19, [#allocation7], %s1293_s28, %s1293_s28, %s1294_s29  }
  0x13   :  { %s1295_s7 = smov [#allocation3]   ;;  %s1220_s11 = scalar_lea.hbm %s1394_s0, 2048 }
  0x14   :  { %s18_s8 = sshll.u32 %s1295_s7, 4  ;;  %p1221_p8 = scmp.ne.s32.totalorder %s1394_s0, %s1220_s11  ;;  %s19_s8 = int_to_ptr.vmem [resolvable:$true] %s18_s8 }
  0x15   :  { %p1224_p9 = scmp.lt.u32.totalorder %s1220_s11, %s1394_s0 }
  0x17   :  { %p1226_p10 = pnand %p1224_p9, %p1221_p8 }
  0x19   :  { %1229 = shalt.err (!%p1226_p10)
}
  0x1a   :  { %s1230_s16 = scalar_lea.vmem %s19_s8, 2048  ;;  %p1235_p12 = scmp.lt.s32.totalorder %s19_s8, %s19_s8 }
  0x1b   :  { %p1231_p11 = scmp.ne.s32.totalorder %s19_s8, %s1230_s16  ;;  %p1236_p13 = scmp.lt.s32.totalorder %s1230_s16, %s1230_s16 }
  0x1d   :  { %p1237_p0 = por %p1236_p13, %p1235_p12 }
  0x1f   :  { %p1238_p1 = pnand %p1237_p0, %p1231_p11 }
  0x21   :  { %1241 = shalt.err (!%p1238_p1)
}
  0x22   :  { %s1296_s1 = smov 1024   ;;  %s1297_s19 = smov [#allocation8]  }
  0x23   :  { %24 = dma.hbm_to_vmem [thread:$0]  %s1394_s0, 2048, %s19_s8, [#allocation4], %s1296_s1, %s1296_s1, %s1293_s28  }
  0x24   :  { %s44_s20 = sshll.u32 %s1297_s19, 4  ;;  %s1242_s23 = scalar_lea.hbm %s1397_s3, 1024  ;;  %s45_s20 = int_to_ptr.vmem [resolvable:$true] %s44_s20 }
  0x25   :  { %p1243_p2 = scmp.ne.s32.totalorder %s1397_s3, %s1242_s23  ;;  %p1246_p3 = scmp.lt.u32.totalorder %s1242_s23, %s1397_s3 }
  0x27   :  { %p1248_p4 = pnand %p1246_p3, %p1243_p2 }
  0x29   :  { %1251 = shalt.err (!%p1248_p4)
}
  0x2a   :  { %s1252_s30 = scalar_lea.vmem %s45_s20, 1024  ;;  %p1257_p6 = scmp.lt.s32.totalorder %s45_s20, %s45_s20 }
  0x2b   :  { %p1253_p5 = scmp.ne.s32.totalorder %s45_s20, %s1252_s30  ;;  %p1258_p7 = scmp.lt.s32.totalorder %s1252_s30, %s1252_s30 }
  0x2d   :  { %p1259_p8 = por %p1258_p7, %p1257_p6 }
  0x2f   :  { %p1260_p9 = pnand %p1259_p8, %p1253_p5 }
  0x31   :  { %1263 = shalt.err (!%p1260_p9)
}
  0x32   :  { %50 = dma.hbm_to_vmem [thread:$0]  %s1397_s3, 1024, %s45_s20, [#allocation7], %s1293_s28, %s1293_s28, %s1294_s29  }
  0x33   :  { %1286 = dma.done.wait [#allocation4], 2048  }
  0x34   :  { %1287 = vsyncadd [#allocation4], 4294965248 }
  0x35   :  { %1288 = dma.done.wait [#allocation7], 9216  }
  0x36   :  { %1289 = vsyncadd [#allocation7], 4294958080  ;;  %v1126_v0 = vld [vmem:[#allocation6 + $0x40] sm:$0xff]   ;;  %v1130_v4 = vld [vmem:[#allocation6 + $0x48] sm:$0xff]   ;;  %vm1299_vm0 = vmmov 0   ;;  %s1300_s7 = smov [#allocation9]  }
  0x37   :  { %v1127_v1 = vld [vmem:[#allocation6 + $0xc0] sm:$0xff]   ;;  %998 = vmatprep.subr.bf16.mxu0 %v1126_v0  ;;  %v1131_v5 = vld [vmem:[#allocation6 + $0xc8] sm:$0xff]   ;;  %v1134_v8 = vld [vmem:[#allocation6 + $0x50] sm:$0xff]   ;;  %s911_s8 = sshll.u32 %s1300_s7, 4  ;;  %s912_s8 = int_to_ptr.vmem [resolvable:$true] %s911_s8 }
  0x38   :  { %v1128_v2 = vld [vmem:[#allocation6] sm:$0xff]   ;;  %1020 = vmatprep.subr.bf16.mxu1 %v1127_v1  ;;  %v1132_v6 = vld [vmem:[#allocation6 + $0x8] sm:$0xff]   ;;  %v1135_v9 = vld [vmem:[#allocation6 + $0xd0] sm:$0xff]   ;;  %s1264_s9 = scalar_lea.vmem %s912_s8, 256  ;;  %p1269_p11 = scmp.lt.s32.totalorder %s912_s8, %s912_s8 }
  0x39   :  { %v1129_v3 = vld [vmem:[#allocation6 + $0x80] sm:$0xff]   ;;  %999 = vmatpush3.bf16.msra.mxu0 %v1128_v2  ;;  %v1133_v7 = vld [vmem:[#allocation6 + $0x88] sm:$0xff]   ;;  %v1136_v10 = vld [vmem:[#allocation6 + $0x10] sm:$0xff]   ;;  %p1265_p10 = scmp.ne.s32.totalorder %s912_s8, %s1264_s9  ;;  %p1270_p12 = scmp.lt.s32.totalorder %s1264_s9, %s1264_s9 }
  0x3a   :  { %1021 = vmatpush3.bf16.msra.mxu1 %v1129_v3  ;;  %1000 = vmatprep.subr.bf16.mxu0 %v1130_v4  ;;  %v1137_v11 = vld [vmem:[#allocation6 + $0x90] sm:$0xff]   ;;  %v1138_v12 = vld [vmem:[#allocation6 + $0x58] sm:$0xff]   ;;  %v1142_v16 = vld [vmem:[#allocation6 + $0x60] sm:$0xff]  }
  0x3b   :  { %1022 = vmatprep.subr.bf16.mxu1 %v1131_v5  ;;  %v1139_v13 = vld [vmem:[#allocation6 + $0xd8] sm:$0xff]   ;;  %v1143_v17 = vld [vmem:[#allocation6 + $0xe0] sm:$0xff]   ;;  %v1146_v20 = vld [vmem:[#allocation6 + $0x68] sm:$0xff]   ;;  %p1271_p13 = por %p1270_p12, %p1269_p11 }
  0x3c   :  { %v1140_v14 = vld [vmem:[#allocation6 + $0x18] sm:$0xff]   ;;  %v1144_v18 = vld [vmem:[#allocation6 + $0x20] sm:$0xff]   ;;  %v1147_v21 = vld [vmem:[#allocation6 + $0xe8] sm:$0xff]  }
  0x3d   :  { %1001 = vmatpush3.bf16.msra.mxu0 %v1132_v6  ;;  %v1141_v15 = vld [vmem:[#allocation6 + $0x98] sm:$0xff]   ;;  %v1145_v19 = vld [vmem:[#allocation6 + $0xa0] sm:$0xff]   ;;  %v1148_v22 = vld [vmem:[#allocation6 + $0x28] sm:$0xff]   ;;  %p1272_p0 = pnand %p1271_p13, %p1265_p10 }
  0x3e   :  { %1023 = vmatpush3.bf16.msra.mxu1 %v1133_v7  ;;  %1002 = vmatprep.subr.bf16.mxu0 %v1134_v8  ;;  %v1149_v23 = vld [vmem:[#allocation6 + $0xa8] sm:$0xff]   ;;  %v1150_v24 = vld [vmem:[#allocation6 + $0x70] sm:$0xff]   ;;  %v1154_v28 = vld [vmem:[#allocation6 + $0x78] sm:$0xff]  }
  0x3f   :  { %1024 = vmatprep.subr.bf16.mxu1 %v1135_v9  ;;  %v1151_v25 = vld [vmem:[#allocation6 + $0xf0] sm:$0xff]   ;;  %v1155_v29 = vld [vmem:[#allocation6 + $0xf8] sm:$0xff]   ;;  %v70_v32 = vld [vmem:[#allocation3 + $0x8] sm:$0xff] }
  0x40   :  { %v1152_v26 = vld [vmem:[#allocation6 + $0x30] sm:$0xff]   ;;  %v1156_v30 = vld [vmem:[#allocation6 + $0x38] sm:$0xff]   ;;  %v78_v33 = vld [vmem:[#allocation3 + $0x48] sm:$0xff] }
  0x41   :  { %1003 = vmatpush3.bf16.msra.mxu0 %v1136_v10  ;;  %v1153_v27 = vld [vmem:[#allocation6 + $0xb0] sm:$0xff]   ;;  %v1157_v31 = vld [vmem:[#allocation6 + $0xb8] sm:$0xff]   ;;  %v86_v35 = vpack.c.bf16 %v78_v33, %v70_v32  ;;  %v69_v37 = vld [vmem:[#allocation3] sm:$0xff] }
  0x42   :  { %1025 = vmatpush3.bf16.msra.mxu1 %v1137_v11  ;;  %1004 = vmatprep.subr.bf16.mxu0 %v1138_v12  ;;  %v72_v34 = vld [vmem:[#allocation3 + $0x18] sm:$0xff]  ;;  %v77_v38 = vld [vmem:[#allocation3 + $0x40] sm:$0xff]  ;;  %v71_v41 = vld [vmem:[#allocation3 + $0x10] sm:$0xff] }
  0x43   :  { %1026 = vmatprep.subr.bf16.mxu1 %v1139_v13  ;;  %v80_v36 = vld [vmem:[#allocation3 + $0x58] sm:$0xff]  ;;  %v85_v40 = vpack.c.bf16 %v77_v38, %v69_v37  ;;  %v79_v42 = vld [vmem:[#allocation3 + $0x50] sm:$0xff]  ;;  %644 = vmatprep.mubr.bf16.mxu0 %v86_v35  ;;  %v1158_v44 = vld [vmem:[#allocation6 + $0x140] sm:$0xff]  }
  0x44   :  { %v88_v39 = vpack.c.bf16 %v80_v36, %v72_v34  ;;  %v87_v43 = vpack.c.bf16 %v79_v42, %v71_v41  ;;  %v1159_v45 = vld [vmem:[#allocation6 + $0x1c0] sm:$0xff]   ;;  %v1162_v48 = vld [vmem:[#allocation6 + $0x148] sm:$0xff]   ;;  %v1166_v52 = vld [vmem:[#allocation6 + $0x150] sm:$0xff]  }
  0x45   :  { %1005 = vmatpush3.bf16.msra.mxu0 %v1140_v14  ;;  %v1160_v46 = vld [vmem:[#allocation6 + $0x100] sm:$0xff]   ;;  %v1163_v49 = vld [vmem:[#allocation6 + $0x1c8] sm:$0xff]   ;;  %v1167_v53 = vld [vmem:[#allocation6 + $0x1d0] sm:$0xff]  }
  0x46   :  { %1027 = vmatpush3.bf16.msra.mxu1 %v1141_v15  ;;  %1006 = vmatprep.subr.bf16.mxu0 %v1142_v16  ;;  %v1161_v47 = vld [vmem:[#allocation6 + $0x180] sm:$0xff]   ;;  %v1164_v50 = vld [vmem:[#allocation6 + $0x108] sm:$0xff]   ;;  %v1168_v54 = vld [vmem:[#allocation6 + $0x110] sm:$0xff]  }
  0x47   :  { %1028 = vmatprep.subr.bf16.mxu1 %v1143_v17  ;;  %685 = vmatprep.mubr.bf16.mxu1 %v88_v39  ;;  %v1165_v51 = vld [vmem:[#allocation6 + $0x188] sm:$0xff]   ;;  %v1169_v55 = vld [vmem:[#allocation6 + $0x190] sm:$0xff]   ;;  %v1170_v56 = vld [vmem:[#allocation6 + $0x158] sm:$0xff]  }
  0x48   :  { %v1171_v57 = vld [vmem:[#allocation6 + $0x1d8] sm:$0xff]   ;;  %v1174_v60 = vld [vmem:[#allocation6 + $0x160] sm:$0xff]   ;;  %v1178_v0 = vld [vmem:[#allocation6 + $0x168] sm:$0xff]  }
  0x49   :  { %1007 = vmatpush3.bf16.msra.mxu0 %v1144_v18  ;;  %v1172_v58 = vld [vmem:[#allocation6 + $0x118] sm:$0xff]   ;;  %v1175_v61 = vld [vmem:[#allocation6 + $0x1e0] sm:$0xff]   ;;  %v1179_v1 = vld [vmem:[#allocation6 + $0x1e8] sm:$0xff]  }
  0x4a   :  { %1029 = vmatpush3.bf16.msra.mxu1 %v1145_v19  ;;  %1008 = vmatprep.subr.bf16.mxu0 %v1146_v20  ;;  %v1173_v59 = vld [vmem:[#allocation6 + $0x198] sm:$0xff]   ;;  %v1176_v62 = vld [vmem:[#allocation6 + $0x120] sm:$0xff]   ;;  %v1180_v2 = vld [vmem:[#allocation6 + $0x128] sm:$0xff]  }
  0x4b   :  { %1030 = vmatprep.subr.bf16.mxu1 %v1147_v21  ;;  %v1177_v63 = vld [vmem:[#allocation6 + $0x1a0] sm:$0xff]   ;;  %v1181_v3 = vld [vmem:[#allocation6 + $0x1a8] sm:$0xff]   ;;  %v1182_v4 = vld [vmem:[#allocation6 + $0x170] sm:$0xff]  }
  0x4c   :  { %v1183_v5 = vld [vmem:[#allocation6 + $0x1f0] sm:$0xff]   ;;  %v1186_v8 = vld [vmem:[#allocation6 + $0x178] sm:$0xff]   ;;  %v74_v12 = vld [vmem:[#allocation3 + $0x28] sm:$0xff] }
  0x4d   :  { %1009 = vmatpush3.bf16.msra.mxu0 %v1148_v22  ;;  %v1184_v6 = vld [vmem:[#allocation6 + $0x130] sm:$0xff]   ;;  %v1187_v9 = vld [vmem:[#allocation6 + $0x1f8] sm:$0xff]   ;;  %v82_v13 = vld [vmem:[#allocation3 + $0x68] sm:$0xff] }
  0x4e   :  { %1031 = vmatpush3.bf16.msra.mxu1 %v1149_v23  ;;  %1010 = vmatprep.subr.bf16.mxu0 %v1150_v24  ;;  %v1185_v7 = vld [vmem:[#allocation6 + $0x1b0] sm:$0xff]   ;;  %v1188_v10 = vld [vmem:[#allocation6 + $0x138] sm:$0xff]   ;;  %v90_v16 = vpack.c.bf16 %v82_v13, %v74_v12  ;;  %v73_v18 = vld [vmem:[#allocation3 + $0x20] sm:$0xff] }
  0x4f   :  { %1032 = vmatprep.subr.bf16.mxu1 %v1151_v25  ;;  %v1189_v11 = vld [vmem:[#allocation6 + $0x1b8] sm:$0xff]   ;;  %v81_v19 = vld [vmem:[#allocation3 + $0x60] sm:$0xff]  ;;  %v75_v20 = vld [vmem:[#allocation3 + $0x30] sm:$0xff]  ;;  %v1298_v25 = vmov 0.0  }
  0x50   :  { %v76_v14 = vld [vmem:[#allocation3 + $0x38] sm:$0xff]  ;;  %v89_v21 = vpack.c.bf16 %v81_v19, %v73_v18  ;;  %v83_v22 = vld [vmem:[#allocation3 + $0x70] sm:$0xff]  ;;  %v1190_v24 = vld [vmem:[#allocation8] sm:$0xff]  }
  0x51   :  { %1011 = vmatpush3.bf16.msra.mxu0 %v1152_v26  ;;  %v84_v15 = vld [vmem:[#allocation3 + $0x78] sm:$0xff]  ;;  %v91_v23 = vpack.c.bf16 %v83_v22, %v75_v20  ;;  %v1191_v26 = vld [vmem:[#allocation8 + $0x8] sm:$0xff]   ;;  %v924_v35 = vld [vmem:[%s1396_s2] ss:$0 sm:$0xff] }
  0x52   :  { %1033 = vmatpush3.bf16.msra.mxu1 %v1153_v27  ;;  %1012 = vmatprep.subr.bf16.mxu0 %v1154_v28  ;;  %v92_v17 = vpack.c.bf16 %v84_v15, %v76_v14  ;;  %v1192_v27 = vld [vmem:[#allocation8 + $0x10] sm:$0xff]   ;;  %v1193_v28 = vld [vmem:[#allocation8 + $0x18] sm:$0xff]  }
  0x53   :  { %1034 = vmatprep.subr.bf16.mxu1 %v1155_v29  ;;  %v1194_v29 = vld [vmem:[#allocation8 + $0x20] sm:$0xff]   ;;  %v1197_v32 = vld [vmem:[#allocation8 + $0x38] sm:$0xff]  }
  0x55   :  { %1013 = vmatpush3.bf16.msra.mxu0 %v1156_v30  ;;  %v1195_v30 = vld [vmem:[#allocation8 + $0x28] sm:$0xff]  }
  0x56   :  { %1035 = vmatpush3.bf16.msra.mxu1 %v1157_v31  ;;  %1042 = vmatprep.subr.bf16.mxu0 %v1158_v44  ;;  %v1196_v31 = vld [vmem:[#allocation8 + $0x30] sm:$0xff]  }
  0x57   :  { %1064 = vmatprep.subr.bf16.mxu1 %v1159_v45 }
  0x58   :  { %645 = vmatmul.mubr.bf16.vlgmr.msra.gmra.mrb[0].mxu0 %v85_v40 }
  0x59   :  { %686 = vmatmul.mubr.bf16.vlgmr.msra.gmra.mrb[0].mxu1 %v87_v43  ;;  %1043 = vmatpush3.bf16.msra.mxu0 %v1160_v46 }
  0x5a   :  { %1065 = vmatpush3.bf16.msra.mxu1 %v1161_v47  ;;  %1044 = vmatprep.subr.bf16.mxu0 %v1162_v48 }
  0x5b   :  { %1066 = vmatprep.subr.bf16.mxu1 %v1163_v49  ;;  %726 = vmatprep.mubr.bf16.mxu0 %v90_v16 }
  0x5c   :  { %767 = vmatprep.mubr.bf16.mxu1 %v92_v17 }
  0x5d   :  { %1045 = vmatpush3.bf16.msra.mxu0 %v1164_v50 }
  0x5e   :  { %1067 = vmatpush3.bf16.msra.mxu1 %v1165_v51  ;;  %1046 = vmatprep.subr.bf16.mxu0 %v1166_v52 }
  0x5f   :  { %1068 = vmatprep.subr.bf16.mxu1 %v1167_v53 }
  0x61   :  { %1047 = vmatpush3.bf16.msra.mxu0 %v1168_v54 }
  0x62   :  { %1069 = vmatpush3.bf16.msra.mxu1 %v1169_v55  ;;  %1048 = vmatprep.subr.bf16.mxu0 %v1170_v56 }
  0x63   :  { %1070 = vmatprep.subr.bf16.mxu1 %v1171_v57 }
  0x65   :  { %1049 = vmatpush3.bf16.msra.mxu0 %v1172_v58 }
  0x66   :  { %1071 = vmatpush3.bf16.msra.mxu1 %v1173_v59  ;;  %1050 = vmatprep.subr.bf16.mxu0 %v1174_v60 }
  0x67   :  { %1072 = vmatprep.subr.bf16.mxu1 %v1175_v61 }
  0x69   :  { %1051 = vmatpush3.bf16.msra.mxu0 %v1176_v62 }
  0x6a   :  { %1073 = vmatpush3.bf16.msra.mxu1 %v1177_v63  ;;  %1052 = vmatprep.subr.bf16.mxu0 %v1178_v0 }
  0x6b   :  { %1074 = vmatprep.subr.bf16.mxu1 %v1179_v1 }
  0x6d   :  { %1053 = vmatpush3.bf16.msra.mxu0 %v1180_v2 }
  0x6e   :  { %1075 = vmatpush3.bf16.msra.mxu1 %v1181_v3  ;;  %1054 = vmatprep.subr.bf16.mxu0 %v1182_v4 }
  0x6f   :  { %1076 = vmatprep.subr.bf16.mxu1 %v1183_v5  ;;  %v997_v5 = vld [vmem:[%s1398_s4] ss:$0 sm:$0xff] }
  0x71   :  { %1055 = vmatpush3.bf16.msra.mxu0 %v1184_v6 }
  0x72   :  { %1077 = vmatpush3.bf16.msra.mxu1 %v1185_v7  ;;  %1056 = vmatprep.subr.bf16.mxu0 %v1186_v8 }
  0x73   :  { %1078 = vmatprep.subr.bf16.mxu1 %v1187_v9 }
  0x75   :  { %1057 = vmatpush3.bf16.msra.mxu0 %v1188_v10 }
  0x76   :  { %1079 = vmatpush3.bf16.msra.mxu1 %v1189_v11  ;;  %1095 = vmatprep.subr.bf16.mxu0 %v1298_v25 }
  0x78   :  { %727 = vmatmul.mubr.bf16.vlgmr.msra.gmra.mrb[4].mxu0 %v89_v21 }
  0x79   :  { %768 = vmatmul.mubr.bf16.vlgmr.msra.gmra.mrb[4].mxu1 %v91_v23  ;;  %1096 = vmatpush3.bf16.msra.mxu0 %v1190_v24 }
  0x7a   :  { %1097 = vmatprep.subr.bf16.mxu0 %v1298_v25  ;;  %1111 = vmatprep.mubr.msk.bf16.mxu0 %vm1299_vm0, %v1298_v25 }
  0x7d   :  { %1098 = vmatpush3.bf16.msra.mxu0 %v1191_v26 }
  0x7e   :  { %1099 = vmatprep.subr.bf16.mxu0 %v1298_v25 }
  0x81   :  { %1100 = vmatpush3.bf16.msra.mxu0 %v1192_v27 }
  0x82   :  { %1101 = vmatprep.subr.bf16.mxu0 %v1298_v25 }
  0x85   :  { %1102 = vmatpush3.bf16.msra.mxu0 %v1193_v28 }
  0x86   :  { %1103 = vmatprep.subr.bf16.mxu0 %v1298_v25 }
  0x89   :  { %1104 = vmatpush3.bf16.msra.mxu0 %v1194_v29 }
  0x8a   :  { %1105 = vmatprep.subr.bf16.mxu0 %v1298_v25 }
  0x8d   :  { %1106 = vmatpush3.bf16.msra.mxu0 %v1195_v30 }
  0x8e   :  { %1107 = vmatprep.subr.bf16.mxu0 %v1298_v25 }
  0x91   :  { %1108 = vmatpush3.bf16.msra.mxu0 %v1196_v31 }
  0x92   :  { %1109 = vmatprep.subr.bf16.mxu0 %v1298_v25 }
  0x95   :  { %1110 = vmatpush3.bf16.msra.mxu0 %v1197_v32 }
 0x12b   :  { %v1014_v33 = vpop.f32.mrb[0].mxu0 }
 0x12c   :  { %v1036_v34 = vpop.f32.mrb[0].mxu1  ;;  %v1015_v36 = vpop.f32.mrb[1].mxu0 }
 0x12d   :  { %v1016_v37 = vadd.f32 %v1015_v36, %v1014_v33  ;;  %v1037_v38 = vpop.f32.mrb[1].mxu1  ;;  %v1017_v39 = vpop.f32.mrb[2].mxu0 }
 0x12e   :  { %v1038_v40 = vadd.f32 %v1037_v38, %v1036_v34  ;;  %v1039_v41 = vpop.f32.mrb[2].mxu1  ;;  %v1018_v42 = vpop.f32.mrb[3].mxu0 }
 0x12f   :  { %v647_v43 = vadd.f32 %v1016_v37, %v924_v35  ;;  %v1019_v44 = vadd.f32 %v1018_v42, %v1017_v39  ;;  %v1040_v45 = vpop.f32.mrb[3].mxu1 }
 0x130   :  { %v1041_v46 = vadd.f32 %v1040_v45, %v1039_v41 }
 0x131   :  { %v688_v47 = vadd.f32 %v1038_v40, %v647_v43  ;;  %v650_v48 = vadd.f32 %v1019_v44, %v924_v35 }
 0x133   :  { %v691_v49 = vadd.f32 %v1041_v46, %v650_v48 }
 0x14b   :  { %v1058_v50 = vpop.f32.mrb[4].mxu0 }
 0x14c   :  { %v1080_v51 = vpop.f32.mrb[4].mxu1  ;;  %v1059_v52 = vpop.f32.mrb[5].mxu0 }
 0x14d   :  { %v1060_v53 = vadd.f32 %v1059_v52, %v1058_v50  ;;  %v1081_v54 = vpop.f32.mrb[5].mxu1  ;;  %v1061_v55 = vpop.f32.mrb[6].mxu0 }
 0x14e   :  { %v1082_v56 = vadd.f32 %v1081_v54, %v1080_v51  ;;  %v1083_v57 = vpop.f32.mrb[6].mxu1  ;;  %v1062_v58 = vpop.f32.mrb[7].mxu0 }
 0x14f   :  { %v729_v59 = vadd.f32 %v1060_v53, %v688_v47  ;;  %v1063_v60 = vadd.f32 %v1062_v58, %v1061_v55  ;;  %v1084_v61 = vpop.f32.mrb[7].mxu1 }
 0x150   :  { %v1085_v62 = vadd.f32 %v1084_v61, %v1083_v57 }
 0x151   :  { %v770_v63 = vadd.f32 %v1082_v56, %v729_v59  ;;  %v732_v0 = vadd.f32 %v1063_v60, %v691_v49 }
 0x153   :  { %v773_v1 = vadd.f32 %v1085_v62, %v732_v0  ;;  %v776_v2 = vmax.f32 %v770_v63, 0.0 }
 0x155   :  { %v777_v3 = vmax.f32 %v773_v1, 0.0 }
 0x157   :  { %v780_v4 = vpack.c.bf16 %v777_v3, %v776_v2 }
 0x159   :  { %1112 = vmatmul.mubr.bf16.vlgmr.msra.gmra.mrb[8].mxu0 %v780_v4 }
 0x22c   :  { %v879_v6 = vpop.f32.mrb[8].mxu0 }
 0x22d   :  { %v902_v7 = vadd.f32 %v997_v5, %v879_v6  ;;  %v1113_v8 = vpop.f32.mrb[9].mxu0 }
 0x22e   :  { %v882_v9 = vpop.f32.mrb[10].mxu0 }
 0x22f   :  { %904 = vst [vmem:[#allocation9] sm:$0xff] %v902_v7  ;;  %v903_v10 = vadd.f32 %v997_v5, %v882_v9  ;;  %v1114_v11 = vpop.f32.mrb[11].mxu0 }
 0x231   :  { %905 = vst [vmem:[#allocation9 + $0x8] sm:$0xff] %v903_v10 }
 0x232   :  { %1275 = shalt.err (!%p1272_p0)
}
 0x233   :  { %s1276_s11 = scalar_lea.hbm %s1399_s5, 256 }
 0x234   :  { %p1277_p1 = scmp.ne.s32.totalorder %s1399_s5, %s1276_s11  ;;  %p1280_p2 = scmp.lt.u32.totalorder %s1276_s11, %s1399_s5 }
 0x236   :  { %p1282_p3 = pnand %p1280_p2, %p1277_p1 }
 0x238   :  { %1285 = shalt.err (!%p1282_p3)
}
 0x239   :  { %s1301_s16 = smov 128   ;;  %s1302_s1 = smov 8  }
 0x23a   :  { %917 = dma.vmem_to_hbm [thread:$0]  %s912_s8, 256, %s1399_s5, [#allocation5], %s1301_s16, %s1301_s16, %s1302_s1  }
 0x23b   :  { %1290 = dma.done.wait [#allocation5], 256  }
 0x23c   :  { %1291 = vsyncadd [#allocation5], 4294967040 }
 0x23d   :  { %921 = vsyncpa [#allocation4], 1 }
 0x23e   :  { %922 = vsyncpa [#allocation7], 1 }
 0x23f   :  { %923 = vsyncpa [#allocation5], 1 }

</bundles_post_ra>
